<compile_context>
chip_gen: v7x
topology: tpu7x:2x2x1
jax: 0.10.0
libtpu: 0.0.40
codegen_flags: <defaults>
</compile_context>

<pallas_src>
import math
import functools

import jax
import jax.numpy as jnp
from jax import lax
from jax.experimental import pallas as pl
from jax.experimental.pallas import tpu as pltpu


def _eattention_kernel(x_ref, wqkv_ref, bqkv_ref, wproj_ref, bproj_ref,
                       out_ref, cls_ref, acc_ref, *, num_heads, bt):
    wqkv = wqkv_ref[...]            # (C, 3C) bf16, q-columns pre-scaled
    bqkv = bqkv_ref[...]            # (1, 3C) f32,  q-part pre-scaled
    wproj = wproj_ref[...]          # (C, C)  bf16
    bproj = bproj_ref[...]          # (1, C)  f32

    _, N, C = x_ref.shape
    hd = C // num_heads
    inv_heads = 1.0 / float(num_heads)

    for b in range(bt):                                    # static, bt is small
        x = x_ref[b]                                       # (N, C) bf16
        # Fused, lane-dense qkv projection: bf16 in, f32 accumulate.
        qkv = jnp.dot(x, wqkv, preferred_element_type=jnp.float32) + bqkv
        qkv_bf = qkv.astype(jnp.bfloat16)                  # (N, 3C)

        cls_acc = jnp.zeros((1, N), dtype=jnp.float32)

        for h in range(num_heads):                         # static unroll
            q = qkv_bf[:, h * hd:(h + 1) * hd]             # (N, hd), pre-scaled
            k = qkv_bf[:, C + h * hd:C + (h + 1) * hd]
            v = qkv_bf[:, 2 * C + h * hd:2 * C + (h + 1) * hd]

            # q @ k^T without materializing a transpose: contract the hd axis.
            s = lax.dot_general(
                q, k, dimension_numbers=(((1,), (1,)), ((), ())),
                preferred_element_type=jnp.float32)        # (N, N) f32

            # Softmax in f32; normalization via EUP reciprocal + VPU multiply.
            s = s - jnp.max(s, axis=-1, keepdims=True)
            e = jnp.exp(s)
            attn = e * pl.reciprocal(jnp.sum(e, axis=-1, keepdims=True),
                                     approx=True)

            cls_acc = cls_acc + attn[0:1, :]               # cls query row

            # TODO(synk): attn_drop / proj_drop are identity (p=0.0 / eval).
            ctx = jnp.dot(attn.astype(jnp.bfloat16), v,
                          preferred_element_type=jnp.float32)   # (N, hd) f32

            # Store-only head concat: no zero-init, no accumulator RMW.
            acc_ref[b * N:(b + 1) * N, h * hd:(h + 1) * hd] = (
                ctx.astype(jnp.bfloat16))

        cls_ref[b] = (cls_acc * inv_heads).astype(cls_ref.dtype)

    # Single full-depth (bt*N, C) @ (C, C) output projection for all bt images.
    y = jnp.dot(acc_ref[...], wproj, preferred_element_type=jnp.float32) + bproj
    for b in range(bt):
        out_ref[b] = y[b * N:(b + 1) * N, :].astype(out_ref.dtype)


def _pick_bt(B):
    for bt in (4, 2, 1):
        if B % bt == 0:
            return bt
    return 1


def eattention_pallas(x, wqkv, wproj, bproj, bqkv=None, *, num_heads):
    B, N, C = x.shape
    assert C % num_heads == 0, "dim must be divisible by num_heads"
    out_dtype = x.dtype
    hd = C // num_heads
    scale = hd ** (-0.5)
    bt = _pick_bt(B)

    # Fold the softmax scale into the q columns of the qkv projection (saves an
    # (N,N) f32 multiply per head inside the kernel).  Cast matmul inputs to
    # bf16 in the wrapper; accumulation inside the kernel stays f32.
    wqkv_bf = wqkv.astype(jnp.float32).at[:, :C].multiply(scale).astype(jnp.bfloat16)
    wproj_bf = wproj.astype(jnp.bfloat16)
    if bqkv is None:
        bqkv = jnp.zeros((3 * C,), jnp.float32)
    bqkv2d = bqkv.astype(jnp.float32).at[:C].multiply(scale).reshape(1, 3 * C)
    bproj2d = bproj.reshape(1, C).astype(jnp.float32)
    x_bf = x.astype(jnp.bfloat16)

    kernel = functools.partial(_eattention_kernel, num_heads=num_heads, bt=bt)

    flops_per_img = (2 * N * C * (3 * C)      # qkv projection
                     + 2 * N * N * C          # q @ k^T (all heads)
                     + 2 * N * N * C          # attn @ v (all heads)
                     + 2 * N * C * C)         # output projection
    cost = pl.CostEstimate(
        flops=int(B * flops_per_img),
        transcendentals=int(B * num_heads * N * N),
        bytes_accessed=int(B * N * C * 2                   # x (bf16)
                           + C * 3 * C * 2 + 3 * C * 4     # wqkv / bqkv
                           + C * C * 2 + C * 4             # wproj / bproj
                           + B * N * C * x.dtype.itemsize  # out
                           + B * N * 4))                   # cls row (f32)

    # Footprint-derived VMEM limit (16-32 MiB): weights + double-buffered
    # activation blocks + concat scratch, with headroom -- never the full
    # 64 MiB per-core VMEM of v7x.
    blk_in = bt * N * C * 2
    blk_out = bt * N * C * x.dtype.itemsize + bt * N * 4
    weights = (C * 3 * C + C * C) * 2 + (3 * C + C) * 4
    scratch = bt * N * C * 2
    est = weights + 2 * blk_in + 2 * blk_out + scratch
    vmem_limit = int(max(16 * 1024 * 1024, min(32 * 1024 * 1024, 4 * est)))

    out, cls_row = pl.pallas_call(
        kernel,
        out_shape=(
            jax.ShapeDtypeStruct((B, N, C), out_dtype),    # projected output
            jax.ShapeDtypeStruct((B, 1, N), jnp.float32),  # mean-over-heads attn[., 0, :]
        ),
        grid=(B // bt,),
        in_specs=[
            pl.BlockSpec((bt, N, C), lambda g: (g, 0, 0)),
            # Grid-invariant weights: single-buffer (index never changes).
            pl.BlockSpec((C, 3 * C), lambda g: (0, 0), pipeline_mode=pl.Buffered(1)),
            pl.BlockSpec((1, 3 * C), lambda g: (0, 0), pipeline_mode=pl.Buffered(1)),
            pl.BlockSpec((C, C), lambda g: (0, 0), pipeline_mode=pl.Buffered(1)),
            pl.BlockSpec((1, C), lambda g: (0, 0), pipeline_mode=pl.Buffered(1)),
        ],
        out_specs=(
            pl.BlockSpec((bt, N, C), lambda g: (g, 0, 0)),
            pl.BlockSpec((bt, 1, N), lambda g: (g, 0, 0)),
        ),
        scratch_shapes=[pltpu.VMEM((bt * N, C), jnp.bfloat16)],  # head-concat buffer
        compiler_params=pltpu.CompilerParams(
            dimension_semantics=("parallel",),
            vmem_limit_bytes=vmem_limit,
        ),
        cost_estimate=cost,
    )(x_bf, wqkv_bf, bqkv2d, wproj_bf, bproj2d)

    cls_attn = cls_row[:, 0, 1:]   # (B, N-1) -- drop cls->cls, like attn[:, :, 0, 1:]
    return out, cls_attn


def eattention_forward(x, params, *, num_heads, keep_rate=1.0, tokens=None):
    """Mirrors EAttention.forward return signature:
       (x, index, idx, cls_attn, left_tokens)."""
    B, N, C = x.shape
    out, cls_attn = eattention_pallas(
        x, params["wqkv"], params["wproj"], params["bproj"],
        params.get("bqkv"), num_heads=num_heads)

    left_tokens = N - 1
    if keep_rate < 1 or tokens is not None:
        left_tokens = math.ceil(keep_rate * (N - 1))
        if tokens is not None:
            left_tokens = tokens
        if left_tokens == N - 1:
            return out, None, None, None, left_tokens
        assert left_tokens >= 1
        # top-k token selection (largest, sorted) -- JAX glue, no Pallas hot path
        _, idx = jax.lax.top_k(cls_attn, left_tokens)            # (B, left_tokens)
        index = jnp.broadcast_to(idx[:, :, None], (B, left_tokens, C))
        return out, index, idx, cls_attn, left_tokens
    return out, None, None, None, left_tokens


def _reference(x, wqkv, wproj, bproj, num_heads):
    B, N, C = x.shape
    hd = C // num_heads
    qkv = (x @ wqkv).reshape(B, N, 3, num_heads, hd).transpose(2, 0, 3, 1, 4)
    q, k, v = qkv[0], qkv[1], qkv[2]
    attn = (q @ jnp.swapaxes(k, -2, -1)) * (hd ** -0.5)
    attn = jax.nn.softmax(attn, axis=-1)
    out = jnp.swapaxes(attn @ v, 1, 2).reshape(B, N, C) @ wproj + bproj
    cls_attn = attn[:, :, 0, 1:].mean(axis=1)
    return out, cls_attn


if __name__ == "__main__":
    B, N, C = 2, 8, 32
    num_heads = 4
    keep_rate = 0.5

    key = jax.random.PRNGKey(0)
    kx, kq, kp, kb = jax.random.split(key, 4)

    x = jax.random.normal(kx, (B, N, C), dtype=jnp.float32)
    bound = 1.0 / math.sqrt(C)
    params = {
        # stored as (in_features, out_features), i.e. torch weight transposed
        "wqkv": jax.random.uniform(kq, (C, 3 * C), jnp.float32, -bound, bound),
        "wproj": jax.random.uniform(kp, (C, C), jnp.float32, -bound, bound),
        "bproj": jax.random.uniform(kb, (C,), jnp.float32, -bound, bound),
        # qkv_bias=False (module default) -> no "bqkv" entry
    }

    out, index, idx, cls_attn, left_tokens = eattention_forward(
        x, params, num_heads=num_heads, keep_rate=keep_rate)
    jax.block_until_ready(out)
    jax.block_until_ready(cls_attn)

    # correctness check against a pure-JAX f32 reference (kernel matmuls run in
    # bf16 with f32 accumulation, so tolerances are bf16-level)
    ref_out, ref_cls = _reference(x, params["wqkv"], params["wproj"],
                                  params["bproj"], num_heads)
    assert jnp.allclose(out, ref_out, atol=1e-1, rtol=1e-1), (
        float(jnp.max(jnp.abs(out - ref_out))))
    assert jnp.allclose(cls_attn, ref_cls, atol=3e-2, rtol=3e-2), (
        float(jnp.max(jnp.abs(cls_attn - ref_cls))))
    assert left_tokens == math.ceil(keep_rate * (N - 1))
    assert idx.shape == (B, left_tokens)
    assert index.shape == (B, left_tokens, C)

    print("KERNEL_OK")
</pallas_src>

<mosaic_0001>
module attributes {stable_mosaic.version = 11 : i64} {
  func.func @_eattention_kernel(%arg0: i32, %arg1: memref<2x8x32xbf16, #tpu.memory_space<vmem>>, %arg2: memref<32x96xbf16, #tpu.memory_space<vmem>>, %arg3: memref<1x96xf32, #tpu.memory_space<vmem>>, %arg4: memref<32x32xbf16, #tpu.memory_space<vmem>>, %arg5: memref<1x32xf32, #tpu.memory_space<vmem>>, %arg6: memref<2x8x32xf32, #tpu.memory_space<vmem>>, %arg7: memref<2x1x8xf32, #tpu.memory_space<vmem>>, %arg8: memref<16x32xbf16, #tpu.memory_space<vmem>>) attributes {dimension_semantics = [#tpu.dimension_semantics<parallel>], iteration_bounds = array<i64: 1>, scalar_prefetch = 0 : i64, scratch_operands = 1 : i64, tpu.core_type = #tpu.core_type<tc>, window_params = [{transform_indices = @transform_0, window_bounds = array<i64: 2, 8, 32>}, {pipeline_mode = #tpu.pipeline_mode<synchronous>, transform_indices = @transform_1, window_bounds = array<i64: 32, 96>}, {pipeline_mode = #tpu.pipeline_mode<synchronous>, transform_indices = @transform_2, window_bounds = array<i64: 1, 96>}, {pipeline_mode = #tpu.pipeline_mode<synchronous>, transform_indices = @transform_3, window_bounds = array<i64: 32, 32>}, {pipeline_mode = #tpu.pipeline_mode<synchronous>, transform_indices = @transform_4, window_bounds = array<i64: 1, 32>}, {transform_indices = @transform_5, window_bounds = array<i64: 2, 8, 32>}, {transform_indices = @transform_6, window_bounds = array<i64: 2, 1, 8>}]} {
    %c0 = arith.constant 0 : index
    %c0_0 = arith.constant 0 : index
    %0 = vector.load %arg2[%c0, %c0_0] : memref<32x96xbf16, #tpu.memory_space<vmem>>, vector<32x96xbf16>
    %c0_1 = arith.constant 0 : index
    %c0_2 = arith.constant 0 : index
    %1 = vector.load %arg3[%c0_1, %c0_2] : memref<1x96xf32, #tpu.memory_space<vmem>>, vector<1x96xf32>
    %c0_3 = arith.constant 0 : index
    %c0_4 = arith.constant 0 : index
    %2 = vector.load %arg4[%c0_3, %c0_4] : memref<32x32xbf16, #tpu.memory_space<vmem>>, vector<32x32xbf16>
    %c0_5 = arith.constant 0 : index
    %c0_6 = arith.constant 0 : index
    %3 = vector.load %arg5[%c0_5, %c0_6] : memref<1x32xf32, #tpu.memory_space<vmem>>, vector<1x32xf32>
    %c0_7 = arith.constant 0 : index
    %c0_8 = arith.constant 0 : index
    %c0_9 = arith.constant 0 : index
    %4 = vector.load %arg1[%c0_7, %c0_8, %c0_9] : memref<2x8x32xbf16, #tpu.memory_space<vmem>>, vector<1x8x32xbf16>
    %5 = vector.shape_cast %4 : vector<1x8x32xbf16> to vector<8x32xbf16>
    %cst = arith.constant dense<0.000000e+00> : vector<8x96xf32>
    %6 = tpu.matmul %5, %0, %cst {dimension_numbers = #tpu.dot_dimension_numbers<[1], [0], [0], [1], [0, 0, 1, 1], [], []>} : vector<8x32xbf16>, vector<32x96xbf16>, vector<8x96xf32> -> vector<8x96xf32>
    %7 = vector.broadcast %1 : vector<1x96xf32> to vector<8x96xf32>
    %8 = arith.addf %6, %7 : vector<8x96xf32>
    %9 = arith.truncf %8 : vector<8x96xf32> to vector<8x96xbf16>
    %cst_10 = arith.constant 0.000000e+00 : f32
    %10 = vector.broadcast %cst_10 : f32 to vector<1x8xf32>
    %11 = vector.extract_strided_slice %9 {offsets = [0, 0], sizes = [8, 8], strides = [1, 1]} : vector<8x96xbf16> to vector<8x8xbf16>
    %12 = vector.extract_strided_slice %9 {offsets = [0, 32], sizes = [8, 8], strides = [1, 1]} : vector<8x96xbf16> to vector<8x8xbf16>
    %13 = vector.extract_strided_slice %9 {offsets = [0, 64], sizes = [8, 8], strides = [1, 1]} : vector<8x96xbf16> to vector<8x8xbf16>
    %cst_11 = arith.constant dense<0.000000e+00> : vector<8x8xf32>
    %14 = tpu.matmul %11, %12, %cst_11 {dimension_numbers = #tpu.dot_dimension_numbers<[1], [1], [0], [0], [0, 0, 1, 0], [], []>} : vector<8x8xbf16>, vector<8x8xbf16>, vector<8x8xf32> -> vector<8x8xf32>
    %cst_12 = arith.constant dense<0xFF800000> : vector<8xf32>
    %15 = vector.multi_reduction <maximumf>, %14, %cst_12 [1] : vector<8x8xf32> to vector<8xf32>
    %16 = vector.shape_cast %15 : vector<8xf32> to vector<8x1xf32>
    %17 = vector.broadcast %16 : vector<8x1xf32> to vector<8x8xf32>
    %18 = arith.subf %14, %17 : vector<8x8xf32>
    %19 = math.exp %18 : vector<8x8xf32>
    %cst_13 = arith.constant dense<0.000000e+00> : vector<8xf32>
    %20 = vector.multi_reduction <add>, %19, %cst_13 [1] : vector<8x8xf32> to vector<8xf32>
    %21 = vector.shape_cast %20 : vector<8xf32> to vector<8x1xf32>
    %22 = tpu.reciprocal %21 {approx = true} : vector<8x1xf32> -> vector<8x1xf32>
    %23 = vector.broadcast %22 : vector<8x1xf32> to vector<8x8xf32>
    %24 = arith.mulf %19, %23 : vector<8x8xf32>
    %25 = vector.extract_strided_slice %24 {offsets = [0, 0], sizes = [1, 8], strides = [1, 1]} : vector<8x8xf32> to vector<1x8xf32>
    %26 = arith.addf %10, %25 : vector<1x8xf32>
    %27 = arith.truncf %24 : vector<8x8xf32> to vector<8x8xbf16>
    %cst_14 = arith.constant dense<0.000000e+00> : vector<8x8xf32>
    %28 = tpu.matmul %27, %13, %cst_14 {dimension_numbers = #tpu.dot_dimension_numbers<[1], [0], [0], [1], [0, 0, 1, 1], [], []>} : vector<8x8xbf16>, vector<8x8xbf16>, vector<8x8xf32> -> vector<8x8xf32>
    %29 = arith.truncf %28 : vector<8x8xf32> to vector<8x8xbf16>
    %c0_15 = arith.constant 0 : index
    %c0_16 = arith.constant 0 : index
    %30 = vector.load %arg8[%c0_15, %c0_16] : memref<16x32xbf16, #tpu.memory_space<vmem>>, vector<8x8xbf16>
    tpu.vector_store %arg8[%c0_15, %c0_16], %29 {strides = array<i32>} : memref<16x32xbf16, #tpu.memory_space<vmem>>, vector<8x8xbf16>,
    %31 = vector.extract_strided_slice %9 {offsets = [0, 8], sizes = [8, 8], strides = [1, 1]} : vector<8x96xbf16> to vector<8x8xbf16>
    %32 = vector.extract_strided_slice %9 {offsets = [0, 40], sizes = [8, 8], strides = [1, 1]} : vector<8x96xbf16> to vector<8x8xbf16>
    %33 = vector.extract_strided_slice %9 {offsets = [0, 72], sizes = [8, 8], strides = [1, 1]} : vector<8x96xbf16> to vector<8x8xbf16>
    %cst_17 = arith.constant dense<0.000000e+00> : vector<8x8xf32>
    %34 = tpu.matmul %31, %32, %cst_17 {dimension_numbers = #tpu.dot_dimension_numbers<[1], [1], [0], [0], [0, 0, 1, 0], [], []>} : vector<8x8xbf16>, vector<8x8xbf16>, vector<8x8xf32> -> vector<8x8xf32>
    %cst_18 = arith.constant dense<0xFF800000> : vector<8xf32>
    %35 = vector.multi_reduction <maximumf>, %34, %cst_18 [1] : vector<8x8xf32> to vector<8xf32>
    %36 = vector.shape_cast %35 : vector<8xf32> to vector<8x1xf32>
    %37 = vector.broadcast %36 : vector<8x1xf32> to vector<8x8xf32>
    %38 = arith.subf %34, %37 : vector<8x8xf32>
    %39 = math.exp %38 : vector<8x8xf32>
    %cst_19 = arith.constant dense<0.000000e+00> : vector<8xf32>
    %40 = vector.multi_reduction <add>, %39, %cst_19 [1] : vector<8x8xf32> to vector<8xf32>
    %41 = vector.shape_cast %40 : vector<8xf32> to vector<8x1xf32>
    %42 = tpu.reciprocal %41 {approx = true} : vector<8x1xf32> -> vector<8x1xf32>
    %43 = vector.broadcast %42 : vector<8x1xf32> to vector<8x8xf32>
    %44 = arith.mulf %39, %43 : vector<8x8xf32>
    %45 = vector.extract_strided_slice %44 {offsets = [0, 0], sizes = [1, 8], strides = [1, 1]} : vector<8x8xf32> to vector<1x8xf32>
    %46 = arith.addf %26, %45 : vector<1x8xf32>
    %47 = arith.truncf %44 : vector<8x8xf32> to vector<8x8xbf16>
    %cst_20 = arith.constant dense<0.000000e+00> : vector<8x8xf32>
    %48 = tpu.matmul %47, %33, %cst_20 {dimension_numbers = #tpu.dot_dimension_numbers<[1], [0], [0], [1], [0, 0, 1, 1], [], []>} : vector<8x8xbf16>, vector<8x8xbf16>, vector<8x8xf32> -> vector<8x8xf32>
    %49 = arith.truncf %48 : vector<8x8xf32> to vector<8x8xbf16>
    %c0_21 = arith.constant 0 : index
    %c8 = arith.constant 8 : index
    %50 = vector.load %arg8[%c0_21, %c8] : memref<16x32xbf16, #tpu.memory_space<vmem>>, vector<8x8xbf16>
    tpu.vector_store %arg8[%c0_21, %c8], %49 {strides = array<i32>} : memref<16x32xbf16, #tpu.memory_space<vmem>>, vector<8x8xbf16>,
    %51 = vector.extract_strided_slice %9 {offsets = [0, 16], sizes = [8, 8], strides = [1, 1]} : vector<8x96xbf16> to vector<8x8xbf16>
    %52 = vector.extract_strided_slice %9 {offsets = [0, 48], sizes = [8, 8], strides = [1, 1]} : vector<8x96xbf16> to vector<8x8xbf16>
    %53 = vector.extract_strided_slice %9 {offsets = [0, 80], sizes = [8, 8], strides = [1, 1]} : vector<8x96xbf16> to vector<8x8xbf16>
    %cst_22 = arith.constant dense<0.000000e+00> : vector<8x8xf32>
    %54 = tpu.matmul %51, %52, %cst_22 {dimension_numbers = #tpu.dot_dimension_numbers<[1], [1], [0], [0], [0, 0, 1, 0], [], []>} : vector<8x8xbf16>, vector<8x8xbf16>, vector<8x8xf32> -> vector<8x8xf32>
    %cst_23 = arith.constant dense<0xFF800000> : vector<8xf32>
    %55 = vector.multi_reduction <maximumf>, %54, %cst_23 [1] : vector<8x8xf32> to vector<8xf32>
    %56 = vector.shape_cast %55 : vector<8xf32> to vector<8x1xf32>
    %57 = vector.broadcast %56 : vector<8x1xf32> to vector<8x8xf32>
    %58 = arith.subf %54, %57 : vector<8x8xf32>
    %59 = math.exp %58 : vector<8x8xf32>
    %cst_24 = arith.constant dense<0.000000e+00> : vector<8xf32>
    %60 = vector.multi_reduction <add>, %59, %cst_24 [1] : vector<8x8xf32> to vector<8xf32>
    %61 = vector.shape_cast %60 : vector<8xf32> to vector<8x1xf32>
    %62 = tpu.reciprocal %61 {approx = true} : vector<8x1xf32> -> vector<8x1xf32>
    %63 = vector.broadcast %62 : vector<8x1xf32> to vector<8x8xf32>
    %64 = arith.mulf %59, %63 : vector<8x8xf32>
    %65 = vector.extract_strided_slice %64 {offsets = [0, 0], sizes = [1, 8], strides = [1, 1]} : vector<8x8xf32> to vector<1x8xf32>
    %66 = arith.addf %46, %65 : vector<1x8xf32>
    %67 = arith.truncf %64 : vector<8x8xf32> to vector<8x8xbf16>
    %cst_25 = arith.constant dense<0.000000e+00> : vector<8x8xf32>
    %68 = tpu.matmul %67, %53, %cst_25 {dimension_numbers = #tpu.dot_dimension_numbers<[1], [0], [0], [1], [0, 0, 1, 1], [], []>} : vector<8x8xbf16>, vector<8x8xbf16>, vector<8x8xf32> -> vector<8x8xf32>
    %69 = arith.truncf %68 : vector<8x8xf32> to vector<8x8xbf16>
    %c0_26 = arith.constant 0 : index
    %c16 = arith.constant 16 : index
    %70 = vector.load %arg8[%c0_26, %c16] : memref<16x32xbf16, #tpu.memory_space<vmem>>, vector<8x8xbf16>
    tpu.vector_store %arg8[%c0_26, %c16], %69 {strides = array<i32>} : memref<16x32xbf16, #tpu.memory_space<vmem>>, vector<8x8xbf16>,
    %71 = vector.extract_strided_slice %9 {offsets = [0, 24], sizes = [8, 8], strides = [1, 1]} : vector<8x96xbf16> to vector<8x8xbf16>
    %72 = vector.extract_strided_slice %9 {offsets = [0, 56], sizes = [8, 8], strides = [1, 1]} : vector<8x96xbf16> to vector<8x8xbf16>
    %73 = vector.extract_strided_slice %9 {offsets = [0, 88], sizes = [8, 8], strides = [1, 1]} : vector<8x96xbf16> to vector<8x8xbf16>
    %cst_27 = arith.constant dense<0.000000e+00> : vector<8x8xf32>
    %74 = tpu.matmul %71, %72, %cst_27 {dimension_numbers = #tpu.dot_dimension_numbers<[1], [1], [0], [0], [0, 0, 1, 0], [], []>} : vector<8x8xbf16>, vector<8x8xbf16>, vector<8x8xf32> -> vector<8x8xf32>
    %cst_28 = arith.constant dense<0xFF800000> : vector<8xf32>
    %75 = vector.multi_reduction <maximumf>, %74, %cst_28 [1] : vector<8x8xf32> to vector<8xf32>
    %76 = vector.shape_cast %75 : vector<8xf32> to vector<8x1xf32>
    %77 = vector.broadcast %76 : vector<8x1xf32> to vector<8x8xf32>
    %78 = arith.subf %74, %77 : vector<8x8xf32>
    %79 = math.exp %78 : vector<8x8xf32>
    %cst_29 = arith.constant dense<0.000000e+00> : vector<8xf32>
    %80 = vector.multi_reduction <add>, %79, %cst_29 [1] : vector<8x8xf32> to vector<8xf32>
    %81 = vector.shape_cast %80 : vector<8xf32> to vector<8x1xf32>
    %82 = tpu.reciprocal %81 {approx = true} : vector<8x1xf32> -> vector<8x1xf32>
    %83 = vector.broadcast %82 : vector<8x1xf32> to vector<8x8xf32>
    %84 = arith.mulf %79, %83 : vector<8x8xf32>
    %85 = vector.extract_strided_slice %84 {offsets = [0, 0], sizes = [1, 8], strides = [1, 1]} : vector<8x8xf32> to vector<1x8xf32>
    %86 = arith.addf %66, %85 : vector<1x8xf32>
    %87 = arith.truncf %84 : vector<8x8xf32> to vector<8x8xbf16>
    %cst_30 = arith.constant dense<0.000000e+00> : vector<8x8xf32>
    %88 = tpu.matmul %87, %73, %cst_30 {dimension_numbers = #tpu.dot_dimension_numbers<[1], [0], [0], [1], [0, 0, 1, 1], [], []>} : vector<8x8xbf16>, vector<8x8xbf16>, vector<8x8xf32> -> vector<8x8xf32>
    %89 = arith.truncf %88 : vector<8x8xf32> to vector<8x8xbf16>
    %c0_31 = arith.constant 0 : index
    %c24 = arith.constant 24 : index
    %90 = vector.load %arg8[%c0_31, %c24] : memref<16x32xbf16, #tpu.memory_space<vmem>>, vector<8x8xbf16>
    tpu.vector_store %arg8[%c0_31, %c24], %89 {strides = array<i32>} : memref<16x32xbf16, #tpu.memory_space<vmem>>, vector<8x8xbf16>,
    %cst_32 = arith.constant 2.500000e-01 : f32
    %91 = vector.broadcast %cst_32 : f32 to vector<1x8xf32>
    %92 = arith.mulf %86, %91 : vector<1x8xf32>
    %c0_33 = arith.constant 0 : index
    %c0_34 = arith.constant 0 : index
    %c0_35 = arith.constant 0 : index
    %93 = vector.load %arg7[%c0_33, %c0_34, %c0_35] : memref<2x1x8xf32, #tpu.memory_space<vmem>>, vector<1x1x8xf32>
    %94 = vector.shape_cast %93 : vector<1x1x8xf32> to vector<1x8xf32>
    %95 = vector.shape_cast %92 : vector<1x8xf32> to vector<1x1x8xf32>
    tpu.vector_store %arg7[%c0_33, %c0_34, %c0_35], %95 {strides = array<i32>} : memref<2x1x8xf32, #tpu.memory_space<vmem>>, vector<1x1x8xf32>,
    %c1 = arith.constant 1 : index
    %c0_36 = arith.constant 0 : index
    %c0_37 = arith.constant 0 : index
    %96 = vector.load %arg1[%c1, %c0_36, %c0_37] : memref<2x8x32xbf16, #tpu.memory_space<vmem>>, vector<1x8x32xbf16>
    %97 = vector.shape_cast %96 : vector<1x8x32xbf16> to vector<8x32xbf16>
    %cst_38 = arith.constant dense<0.000000e+00> : vector<8x96xf32>
    %98 = tpu.matmul %97, %0, %cst_38 {dimension_numbers = #tpu.dot_dimension_numbers<[1], [0], [0], [1], [0, 0, 1, 1], [], []>} : vector<8x32xbf16>, vector<32x96xbf16>, vector<8x96xf32> -> vector<8x96xf32>
    %99 = vector.broadcast %1 : vector<1x96xf32> to vector<8x96xf32>
    %100 = arith.addf %98, %99 : vector<8x96xf32>
    %101 = arith.truncf %100 : vector<8x96xf32> to vector<8x96xbf16>
    %cst_39 = arith.constant 0.000000e+00 : f32
    %102 = vector.broadcast %cst_39 : f32 to vector<1x8xf32>
    %103 = vector.extract_strided_slice %101 {offsets = [0, 0], sizes = [8, 8], strides = [1, 1]} : vector<8x96xbf16> to vector<8x8xbf16>
    %104 = vector.extract_strided_slice %101 {offsets = [0, 32], sizes = [8, 8], strides = [1, 1]} : vector<8x96xbf16> to vector<8x8xbf16>
    %105 = vector.extract_strided_slice %101 {offsets = [0, 64], sizes = [8, 8], strides = [1, 1]} : vector<8x96xbf16> to vector<8x8xbf16>
    %cst_40 = arith.constant dense<0.000000e+00> : vector<8x8xf32>
    %106 = tpu.matmul %103, %104, %cst_40 {dimension_numbers = #tpu.dot_dimension_numbers<[1], [1], [0], [0], [0, 0, 1, 0], [], []>} : vector<8x8xbf16>, vector<8x8xbf16>, vector<8x8xf32> -> vector<8x8xf32>
    %cst_41 = arith.constant dense<0xFF800000> : vector<8xf32>
    %107 = vector.multi_reduction <maximumf>, %106, %cst_41 [1] : vector<8x8xf32> to vector<8xf32>
    %108 = vector.shape_cast %107 : vector<8xf32> to vector<8x1xf32>
    %109 = vector.broadcast %108 : vector<8x1xf32> to vector<8x8xf32>
    %110 = arith.subf %106, %109 : vector<8x8xf32>
    %111 = math.exp %110 : vector<8x8xf32>
    %cst_42 = arith.constant dense<0.000000e+00> : vector<8xf32>
    %112 = vector.multi_reduction <add>, %111, %cst_42 [1] : vector<8x8xf32> to vector<8xf32>
    %113 = vector.shape_cast %112 : vector<8xf32> to vector<8x1xf32>
    %114 = tpu.reciprocal %113 {approx = true} : vector<8x1xf32> -> vector<8x1xf32>
    %115 = vector.broadcast %114 : vector<8x1xf32> to vector<8x8xf32>
    %116 = arith.mulf %111, %115 : vector<8x8xf32>
    %117 = vector.extract_strided_slice %116 {offsets = [0, 0], sizes = [1, 8], strides = [1, 1]} : vector<8x8xf32> to vector<1x8xf32>
    %118 = arith.addf %102, %117 : vector<1x8xf32>
    %119 = arith.truncf %116 : vector<8x8xf32> to vector<8x8xbf16>
    %cst_43 = arith.constant dense<0.000000e+00> : vector<8x8xf32>
    %120 = tpu.matmul %119, %105, %cst_43 {dimension_numbers = #tpu.dot_dimension_numbers<[1], [0], [0], [1], [0, 0, 1, 1], [], []>} : vector<8x8xbf16>, vector<8x8xbf16>, vector<8x8xf32> -> vector<8x8xf32>
    %121 = arith.truncf %120 : vector<8x8xf32> to vector<8x8xbf16>
    %c8_44 = arith.constant 8 : index
    %c0_45 = arith.constant 0 : index
    %122 = vector.load %arg8[%c8_44, %c0_45] : memref<16x32xbf16, #tpu.memory_space<vmem>>, vector<8x8xbf16>
    tpu.vector_store %arg8[%c8_44, %c0_45], %121 {strides = array<i32>} : memref<16x32xbf16, #tpu.memory_space<vmem>>, vector<8x8xbf16>,
    %123 = vector.extract_strided_slice %101 {offsets = [0, 8], sizes = [8, 8], strides = [1, 1]} : vector<8x96xbf16> to vector<8x8xbf16>
    %124 = vector.extract_strided_slice %101 {offsets = [0, 40], sizes = [8, 8], strides = [1, 1]} : vector<8x96xbf16> to vector<8x8xbf16>
    %125 = vector.extract_strided_slice %101 {offsets = [0, 72], sizes = [8, 8], strides = [1, 1]} : vector<8x96xbf16> to vector<8x8xbf16>
    %cst_46 = arith.constant dense<0.000000e+00> : vector<8x8xf32>
    %126 = tpu.matmul %123, %124, %cst_46 {dimension_numbers = #tpu.dot_dimension_numbers<[1], [1], [0], [0], [0, 0, 1, 0], [], []>} : vector<8x8xbf16>, vector<8x8xbf16>, vector<8x8xf32> -> vector<8x8xf32>
    %cst_47 = arith.constant dense<0xFF800000> : vector<8xf32>
    %127 = vector.multi_reduction <maximumf>, %126, %cst_47 [1] : vector<8x8xf32> to vector<8xf32>
    %128 = vector.shape_cast %127 : vector<8xf32> to vector<8x1xf32>
    %129 = vector.broadcast %128 : vector<8x1xf32> to vector<8x8xf32>
    %130 = arith.subf %126, %129 : vector<8x8xf32>
    %131 = math.exp %130 : vector<8x8xf32>
    %cst_48 = arith.constant dense<0.000000e+00> : vector<8xf32>
    %132 = vector.multi_reduction <add>, %131, %cst_48 [1] : vector<8x8xf32> to vector<8xf32>
    %133 = vector.shape_cast %132 : vector<8xf32> to vector<8x1xf32>
    %134 = tpu.reciprocal %133 {approx = true} : vector<8x1xf32> -> vector<8x1xf32>
    %135 = vector.broadcast %134 : vector<8x1xf32> to vector<8x8xf32>
    %136 = arith.mulf %131, %135 : vector<8x8xf32>
    %137 = vector.extract_strided_slice %136 {offsets = [0, 0], sizes = [1, 8], strides = [1, 1]} : vector<8x8xf32> to vector<1x8xf32>
    %138 = arith.addf %118, %137 : vector<1x8xf32>
    %139 = arith.truncf %136 : vector<8x8xf32> to vector<8x8xbf16>
    %cst_49 = arith.constant dense<0.000000e+00> : vector<8x8xf32>
    %140 = tpu.matmul %139, %125, %cst_49 {dimension_numbers = #tpu.dot_dimension_numbers<[1], [0], [0], [1], [0, 0, 1, 1], [], []>} : vector<8x8xbf16>, vector<8x8xbf16>, vector<8x8xf32> -> vector<8x8xf32>
    %141 = arith.truncf %140 : vector<8x8xf32> to vector<8x8xbf16>
    %c8_50 = arith.constant 8 : index
    %c8_51 = arith.constant 8 : index
    %142 = vector.load %arg8[%c8_50, %c8_51] : memref<16x32xbf16, #tpu.memory_space<vmem>>, vector<8x8xbf16>
    tpu.vector_store %arg8[%c8_50, %c8_51], %141 {strides = array<i32>} : memref<16x32xbf16, #tpu.memory_space<vmem>>, vector<8x8xbf16>,
    %143 = vector.extract_strided_slice %101 {offsets = [0, 16], sizes = [8, 8], strides = [1, 1]} : vector<8x96xbf16> to vector<8x8xbf16>
    %144 = vector.extract_strided_slice %101 {offsets = [0, 48], sizes = [8, 8], strides = [1, 1]} : vector<8x96xbf16> to vector<8x8xbf16>
    %145 = vector.extract_strided_slice %101 {offsets = [0, 80], sizes = [8, 8], strides = [1, 1]} : vector<8x96xbf16> to vector<8x8xbf16>
    %cst_52 = arith.constant dense<0.000000e+00> : vector<8x8xf32>
    %146 = tpu.matmul %143, %144, %cst_52 {dimension_numbers = #tpu.dot_dimension_numbers<[1], [1], [0], [0], [0, 0, 1, 0], [], []>} : vector<8x8xbf16>, vector<8x8xbf16>, vector<8x8xf32> -> vector<8x8xf32>
    %cst_53 = arith.constant dense<0xFF800000> : vector<8xf32>
    %147 = vector.multi_reduction <maximumf>, %146, %cst_53 [1] : vector<8x8xf32> to vector<8xf32>
    %148 = vector.shape_cast %147 : vector<8xf32> to vector<8x1xf32>
    %149 = vector.broadcast %148 : vector<8x1xf32> to vector<8x8xf32>
    %150 = arith.subf %146, %149 : vector<8x8xf32>
    %151 = math.exp %150 : vector<8x8xf32>
    %cst_54 = arith.constant dense<0.000000e+00> : vector<8xf32>
    %152 = vector.multi_reduction <add>, %151, %cst_54 [1] : vector<8x8xf32> to vector<8xf32>
    %153 = vector.shape_cast %152 : vector<8xf32> to vector<8x1xf32>
    %154 = tpu.reciprocal %153 {approx = true} : vector<8x1xf32> -> vector<8x1xf32>
    %155 = vector.broadcast %154 : vector<8x1xf32> to vector<8x8xf32>
    %156 = arith.mulf %151, %155 : vector<8x8xf32>
    %157 = vector.extract_strided_slice %156 {offsets = [0, 0], sizes = [1, 8], strides = [1, 1]} : vector<8x8xf32> to vector<1x8xf32>
    %158 = arith.addf %138, %157 : vector<1x8xf32>
    %159 = arith.truncf %156 : vector<8x8xf32> to vector<8x8xbf16>
    %cst_55 = arith.constant dense<0.000000e+00> : vector<8x8xf32>
    %160 = tpu.matmul %159, %145, %cst_55 {dimension_numbers = #tpu.dot_dimension_numbers<[1], [0], [0], [1], [0, 0, 1, 1], [], []>} : vector<8x8xbf16>, vector<8x8xbf16>, vector<8x8xf32> -> vector<8x8xf32>
    %161 = arith.truncf %160 : vector<8x8xf32> to vector<8x8xbf16>
    %c8_56 = arith.constant 8 : index
    %c16_57 = arith.constant 16 : index
    %162 = vector.load %arg8[%c8_56, %c16_57] : memref<16x32xbf16, #tpu.memory_space<vmem>>, vector<8x8xbf16>
    tpu.vector_store %arg8[%c8_56, %c16_57], %161 {strides = array<i32>} : memref<16x32xbf16, #tpu.memory_space<vmem>>, vector<8x8xbf16>,
    %163 = vector.extract_strided_slice %101 {offsets = [0, 24], sizes = [8, 8], strides = [1, 1]} : vector<8x96xbf16> to vector<8x8xbf16>
    %164 = vector.extract_strided_slice %101 {offsets = [0, 56], sizes = [8, 8], strides = [1, 1]} : vector<8x96xbf16> to vector<8x8xbf16>
    %165 = vector.extract_strided_slice %101 {offsets = [0, 88], sizes = [8, 8], strides = [1, 1]} : vector<8x96xbf16> to vector<8x8xbf16>
    %cst_58 = arith.constant dense<0.000000e+00> : vector<8x8xf32>
    %166 = tpu.matmul %163, %164, %cst_58 {dimension_numbers = #tpu.dot_dimension_numbers<[1], [1], [0], [0], [0, 0, 1, 0], [], []>} : vector<8x8xbf16>, vector<8x8xbf16>, vector<8x8xf32> -> vector<8x8xf32>
    %cst_59 = arith.constant dense<0xFF800000> : vector<8xf32>
    %167 = vector.multi_reduction <maximumf>, %166, %cst_59 [1] : vector<8x8xf32> to vector<8xf32>
    %168 = vector.shape_cast %167 : vector<8xf32> to vector<8x1xf32>
    %169 = vector.broadcast %168 : vector<8x1xf32> to vector<8x8xf32>
    %170 = arith.subf %166, %169 : vector<8x8xf32>
    %171 = math.exp %170 : vector<8x8xf32>
    %cst_60 = arith.constant dense<0.000000e+00> : vector<8xf32>
    %172 = vector.multi_reduction <add>, %171, %cst_60 [1] : vector<8x8xf32> to vector<8xf32>
    %173 = vector.shape_cast %172 : vector<8xf32> to vector<8x1xf32>
    %174 = tpu.reciprocal %173 {approx = true} : vector<8x1xf32> -> vector<8x1xf32>
    %175 = vector.broadcast %174 : vector<8x1xf32> to vector<8x8xf32>
    %176 = arith.mulf %171, %175 : vector<8x8xf32>
    %177 = vector.extract_strided_slice %176 {offsets = [0, 0], sizes = [1, 8], strides = [1, 1]} : vector<8x8xf32> to vector<1x8xf32>
    %178 = arith.addf %158, %177 : vector<1x8xf32>
    %179 = arith.truncf %176 : vector<8x8xf32> to vector<8x8xbf16>
    %cst_61 = arith.constant dense<0.000000e+00> : vector<8x8xf32>
    %180 = tpu.matmul %179, %165, %cst_61 {dimension_numbers = #tpu.dot_dimension_numbers<[1], [0], [0], [1], [0, 0, 1, 1], [], []>} : vector<8x8xbf16>, vector<8x8xbf16>, vector<8x8xf32> -> vector<8x8xf32>
    %181 = arith.truncf %180 : vector<8x8xf32> to vector<8x8xbf16>
    %c8_62 = arith.constant 8 : index
    %c24_63 = arith.constant 24 : index
    %182 = vector.load %arg8[%c8_62, %c24_63] : memref<16x32xbf16, #tpu.memory_space<vmem>>, vector<8x8xbf16>
    tpu.vector_store %arg8[%c8_62, %c24_63], %181 {strides = array<i32>} : memref<16x32xbf16, #tpu.memory_space<vmem>>, vector<8x8xbf16>,
    %cst_64 = arith.constant 2.500000e-01 : f32
    %183 = vector.broadcast %cst_64 : f32 to vector<1x8xf32>
    %184 = arith.mulf %178, %183 : vector<1x8xf32>
    %c1_65 = arith.constant 1 : index
    %c0_66 = arith.constant 0 : index
    %c0_67 = arith.constant 0 : index
    %185 = vector.load %arg7[%c1_65, %c0_66, %c0_67] : memref<2x1x8xf32, #tpu.memory_space<vmem>>, vector<1x1x8xf32>
    %186 = vector.shape_cast %185 : vector<1x1x8xf32> to vector<1x8xf32>
    %187 = vector.shape_cast %184 : vector<1x8xf32> to vector<1x1x8xf32>
    tpu.vector_store %arg7[%c1_65, %c0_66, %c0_67], %187 {strides = array<i32>} : memref<2x1x8xf32, #tpu.memory_space<vmem>>, vector<1x1x8xf32>,
    %c0_68 = arith.constant 0 : index
    %c0_69 = arith.constant 0 : index
    %188 = vector.load %arg8[%c0_68, %c0_69] : memref<16x32xbf16, #tpu.memory_space<vmem>>, vector<16x32xbf16>
    %cst_70 = arith.constant dense<0.000000e+00> : vector<16x32xf32>
    %189 = tpu.matmul %188, %2, %cst_70 {dimension_numbers = #tpu.dot_dimension_numbers<[1], [0], [0], [1], [0, 0, 1, 1], [], []>} : vector<16x32xbf16>, vector<32x32xbf16>, vector<16x32xf32> -> vector<16x32xf32>
    %190 = vector.broadcast %3 : vector<1x32xf32> to vector<16x32xf32>
    %191 = arith.addf %189, %190 : vector<16x32xf32>
    %192 = vector.extract_strided_slice %191 {offsets = [0, 0], sizes = [8, 32], strides = [1, 1]} : vector<16x32xf32> to vector<8x32xf32>
    %c0_71 = arith.constant 0 : index
    %c0_72 = arith.constant 0 : index
    %c0_73 = arith.constant 0 : index
    %193 = vector.load %arg6[%c0_71, %c0_72, %c0_73] : memref<2x8x32xf32, #tpu.memory_space<vmem>>, vector<1x8x32xf32>
    %194 = vector.shape_cast %193 : vector<1x8x32xf32> to vector<8x32xf32>
    %195 = vector.shape_cast %192 : vector<8x32xf32> to vector<1x8x32xf32>
    tpu.vector_store %arg6[%c0_71, %c0_72, %c0_73], %195 {strides = array<i32>} : memref<2x8x32xf32, #tpu.memory_space<vmem>>, vector<1x8x32xf32>,
    %196 = vector.extract_strided_slice %191 {offsets = [8, 0], sizes = [8, 32], strides = [1, 1]} : vector<16x32xf32> to vector<8x32xf32>
    %c1_74 = arith.constant 1 : index
    %c0_75 = arith.constant 0 : index
    %c0_76 = arith.constant 0 : index
    %197 = vector.load %arg6[%c1_74, %c0_75, %c0_76] : memref<2x8x32xf32, #tpu.memory_space<vmem>>, vector<1x8x32xf32>
    %198 = vector.shape_cast %197 : vector<1x8x32xf32> to vector<8x32xf32>
    %199 = vector.shape_cast %196 : vector<8x32xf32> to vector<1x8x32xf32>
    tpu.vector_store %arg6[%c1_74, %c0_75, %c0_76], %199 {strides = array<i32>} : memref<2x8x32xf32, #tpu.memory_space<vmem>>, vector<1x8x32xf32>,
    return
  }
  func.func @transform_0(%arg0: i32) -> (i32, i32, i32) {
    %c0_i32 = arith.constant 0 : i32
    %c0_i32_0 = arith.constant 0 : i32
    %c0_i32_1 = arith.constant 0 : i32
    return %arg0, %c0_i32, %c0_i32_0 : i32, i32, i32
  }
  func.func @transform_1(%arg0: i32) -> (i32, i32) {
    %c0_i32 = arith.constant 0 : i32
    %c0_i32_0 = arith.constant 0 : i32
    %c0_i32_1 = arith.constant 0 : i32
    return %c0_i32, %c0_i32_0 : i32, i32
  }
  func.func @transform_2(%arg0: i32) -> (i32, i32) {
    %c0_i32 = arith.constant 0 : i32
    %c0_i32_0 = arith.constant 0 : i32
    %c0_i32_1 = arith.constant 0 : i32
    return %c0_i32, %c0_i32_0 : i32, i32
  }
  func.func @transform_3(%arg0: i32) -> (i32, i32) {
    %c0_i32 = arith.constant 0 : i32
    %c0_i32_0 = arith.constant 0 : i32
    %c0_i32_1 = arith.constant 0 : i32
    return %c0_i32, %c0_i32_0 : i32, i32
  }
  func.func @transform_4(%arg0: i32) -> (i32, i32) {
    %c0_i32 = arith.constant 0 : i32
    %c0_i32_0 = arith.constant 0 : i32
    %c0_i32_1 = arith.constant 0 : i32
    return %c0_i32, %c0_i32_0 : i32, i32
  }
  func.func @transform_5(%arg0: i32) -> (i32, i32, i32) {
    %c0_i32 = arith.constant 0 : i32
    %c0_i32_0 = arith.constant 0 : i32
    %c0_i32_1 = arith.constant 0 : i32
    return %arg0, %c0_i32, %c0_i32_0 : i32, i32, i32
  }
  func.func @transform_6(%arg0: i32) -> (i32, i32, i32) {
    %c0_i32 = arith.constant 0 : i32
    %c0_i32_0 = arith.constant 0 : i32
    %c0_i32_1 = arith.constant 0 : i32
    return %arg0, %c0_i32, %c0_i32_0 : i32, i32, i32
  }
}

</mosaic_0001>

<bundles_post_ra>
// kernel: tpu_custom_call.1
= control target key start
LH: loop header
LB: loop body
LE: loop exit
PB: predicated region body
PF: predicated region fallthrough
CT: control target
= control target key end

     0   :  { %12 = vsyncpa [#allocation4], 0  ;;  %s1933_s0 = inlined_call_operand.hbm [shape: bf16[2,8,32], index: 0, kind: input, shape index: {}]   ;;  %s1934_s1 = inlined_call_operand.hbm [shape: bf16[32,96], index: 1, kind: input, shape index: {}]   ;;  %s1935_s2 = inlined_call_operand.vmem [shape: f32[1,96], index: 2, kind: input, shape index: {}]   ;;  %s1936_s3 = inlined_call_operand.hbm [shape: bf16[32,32], index: 3, kind: input, shape index: {}]   ;;  %s1937_s4 = inlined_call_operand.vmem [shape: f32[1,32], index: 4, kind: input, shape index: {}]   ;;  %s1938_s5 = inlined_call_operand.hbm [shape: f32[2,8,32], index: 5, kind: output, shape index: {0}]   ;;  %s1939_s6 = inlined_call_operand.hbm [shape: f32[2,1,8], index: 6, kind: output, shape index: {1}]  }
   0x1   :  { %13 = vsyncpa [#allocation7], 0 }
   0x2   :  { %14 = vsyncpa [#allocation5], 0 }
   0x3   :  { %15 = vsyncpa [#allocation11], 0  ;;  %s1598_s21 = smov [#allocation6]   ;;  %s1599_s23 = smov [#allocation3]  }
   0x4   :  { %s33_s22 = sshll.u32 %s1598_s21, 4  ;;  %s21_s24 = sshll.u32 %s1599_s23, 4  ;;  %s34_s22 = int_to_ptr.vmem [resolvable:$true] %s33_s22  ;;  %s1657_s24 = int_to_ptr.vmem [resolvable:$true] %s21_s24 }
   0x5   :  { %s1480_s27 = scalar_lea.hbm %s1934_s1, 256 }
   0x6   :  { %p1481_p0 = scmp.ne.s32.totalorder %s1934_s1, %s1480_s27  ;;  %p1484_p1 = scmp.lt.u32.totalorder %s1480_s27, %s1934_s1 }
   0x8   :  { %p1486_p2 = pnand %p1484_p1, %p1481_p0 }
   0xa   :  { %1489 = shalt.err (!%p1486_p2)
}
   0xb   :  { %s1490_s8 = scalar_lea.vmem %s34_s22, 256  ;;  %p1495_p4 = scmp.lt.s32.totalorder %s34_s22, %s34_s22 }
   0xc   :  { %p1491_p3 = scmp.ne.s32.totalorder %s34_s22, %s1490_s8  ;;  %p1496_p5 = scmp.lt.s32.totalorder %s1490_s8, %s1490_s8 }
   0xe   :  { %p1497_p6 = por %p1496_p5, %p1495_p4 }
  0x10   :  { %p1498_p7 = pnand %p1497_p6, %p1491_p3 }
  0x12   :  { %1501 = shalt.err (!%p1498_p7)
}
  0x13   :  { %s1600_s9 = smov 64   ;;  %s1601_s10 = smov 4  }
  0x14   :  { %39 = dma.hbm_to_vmem [thread:$0]  %s1934_s1, 256, %s34_s22, [#allocation7], %s1600_s9, %s1600_s9, %s1601_s10  }
  0x15   :  { %s1502_s15 = scalar_lea.hbm %s1933_s0, 128 }
  0x16   :  { %p1503_p8 = scmp.ne.s32.totalorder %s1933_s0, %s1502_s15  ;;  %p1506_p9 = scmp.lt.u32.totalorder %s1502_s15, %s1933_s0 }
  0x18   :  { %p1508_p10 = pnand %p1506_p9, %p1503_p8 }
  0x1a   :  { %1511 = shalt.err (!%p1508_p10)
}
  0x1b   :  { %s1512_s20 = scalar_lea.vmem %s1657_s24, 128  ;;  %p1517_p12 = scmp.lt.s32.totalorder %s1657_s24, %s1657_s24 }
  0x1c   :  { %p1513_p11 = scmp.ne.s32.totalorder %s1657_s24, %s1512_s20  ;;  %p1518_p13 = scmp.lt.s32.totalorder %s1512_s20, %s1512_s20 }
  0x1e   :  { %p1519_p0 = por %p1518_p13, %p1517_p12 }
  0x20   :  { %p1520_p1 = pnand %p1519_p0, %p1513_p11 }
  0x22   :  { %1523 = shalt.err (!%p1520_p1)
}
  0x23   :  { %27 = dma.hbm_to_vmem [thread:$0]  %s1933_s0, 128, %s1657_s24, [#allocation4], %s1600_s9, %s1600_s9, %s1601_s10  }
  0x24   :  { %s1602_s22 = smov [#allocation8]   ;;  %s1524_s27 = scalar_lea.hbm %s1936_s3, 256 }
  0x25   :  { %s47_s23 = sshll.u32 %s1602_s22, 4  ;;  %p1525_p2 = scmp.ne.s32.totalorder %s1936_s3, %s1524_s27  ;;  %s48_s23 = int_to_ptr.vmem [resolvable:$true] %s47_s23 }
  0x26   :  { %p1528_p3 = scmp.lt.u32.totalorder %s1524_s27, %s1936_s3 }
  0x28   :  { %p1530_p4 = pnand %p1528_p3, %p1525_p2 }
  0x2a   :  { %1533 = shalt.err (!%p1530_p4)
}
  0x2b   :  { %s1534_s8 = scalar_lea.vmem %s48_s23, 256  ;;  %p1539_p6 = scmp.lt.s32.totalorder %s48_s23, %s48_s23 }
  0x2c   :  { %p1535_p5 = scmp.ne.s32.totalorder %s48_s23, %s1534_s8  ;;  %p1540_p7 = scmp.lt.s32.totalorder %s1534_s8, %s1534_s8 }
  0x2e   :  { %p1541_p8 = por %p1540_p7, %p1539_p6 }
  0x30   :  { %p1542_p9 = pnand %p1541_p8, %p1535_p5 }
  0x32   :  { %1545 = shalt.err (!%p1542_p9)
}
  0x33   :  { %53 = dma.hbm_to_vmem [thread:$0]  %s1936_s3, 256, %s48_s23, [#allocation7], %s1600_s9, %s1600_s9, %s1601_s10  }
  0x34   :  { %1590 = dma.done.wait [#allocation4], 128  }
  0x35   :  { %1591 = vsyncadd [#allocation4], 4294967168 }
  0x36   :  { %1592 = dma.done.wait [#allocation7], 512  }
  0x37   :  { %1593 = vsyncadd [#allocation7], 4294966784  ;;  %v1603_v0 = vmov 0.0   ;;  %vm1604_vm0 = vmmov 0   ;;  %v1444_v1 = vld [vmem:[#allocation6] sm:$0xff]   ;;  %v1445_v2 = vld [vmem:[#allocation6 + $0x8] sm:$0xff]  }
  0x38   :  { %1300 = vmatprep.subr.bf16.mxu0 %v1603_v0  ;;  %1304 = vmatprep.mubr.msk.bf16.mxu0 %vm1604_vm0, %v1603_v0  ;;  %v76_v3 = vld [vmem:[#allocation3] sm:$0xf]  ;;  %vm95_vm1 = vcmask 261120   ;;  %v1723_v4 = vld [vmem:[%s1935_s2] ss:$0 sm:$0xff]  ;;  %s1605_s11 = smov 120  }
  0x39   :  { %1308 = vmatprep.subr.bf16.mxu1 %v1603_v0  ;;  %1310 = vmatprep.mubr.msk.bf16.mxu1 %vm1604_vm0, %v1603_v0  ;;  %s1606_s12 = smov 96   ;;  %s1607_s13 = smov 80   ;;  %vm143_vm2 = vcmask 64512   ;;  %v613_v22 = vld [vmem:[#allocation3 + $0x4] sm:$0xf]  ;;  %vm208_vm3 = vcmask 1043456  }
  0x3a   :  { %1301 = vmatpush3.bf16.msra.mxu0 %v1444_v1  ;;  %s1608_s2 = smov 88   ;;  %s1609_s14 = smov 72   ;;  %vm610_vm4 = vcmask 57344   ;;  %vm253_vm5 = vcmask 60416   ;;  %vm371_vm6 = vcmask 126016   ;;  %vm489_vm7 = vcmask 191616  }
  0x3b   :  { %1302 = vmatprep.subr.bf16.mxu0 %v1603_v0  ;;  %s1610_s15 = smov 112   ;;  %s1611_s16 = smov 104   ;;  %vm607_vm8 = vcmask 257216   ;;  %vm772_vm9 = vcmask 64516   ;;  %vm891_vm10 = vcmask 130116   ;;  %vm1010_vm11 = vcmask 195716  }
  0x3c   :  { %s1612_s17 = smov 56   ;;  %s1613_s18 = smov 48   ;;  %vm1129_vm12 = vcmask 261316  }
  0x3d   :  { %s1614_s19 = smov 40   ;;  %s1615_s20 = smov 8  }
  0x3e   :  { %1303 = vmatpush3.bf16.msra.mxu0 %v1445_v2  ;;  %s1617_s1 = smov 24   ;;  %s1618_s21 = smov [#allocation10]  }
  0x3f   :  { %1314 = vmatprep.subr.bf16.mxu0 %v1603_v0  ;;  %s1217_s22 = sshll.u32 %s1618_s21, 4  ;;  %s1218_s22 = int_to_ptr.vmem [resolvable:$true] %s1217_s22 }
  0x40   :  { %s1546_s23 = scalar_lea.vmem %s1218_s22, 32  ;;  %p1551_p11 = scmp.lt.s32.totalorder %s1218_s22, %s1218_s22 }
  0x41   :  { %1305 = vmatmul.mubr.msk.bf16.vlgmr.msra.gmra.mrb[0].mxu0 %vm95_vm1, %v76_v3  ;;  %p1547_p10 = scmp.ne.s32.totalorder %s1218_s22, %s1546_s23  ;;  %p1552_p12 = scmp.lt.s32.totalorder %s1546_s23, %s1546_s23 }
  0x42   :  { %1316 = vmatprep.mubr.msk.bf16.mxu0 %vm1604_vm0, %v1603_v0 }
  0x43   :  { %p1553_p13 = por %p1552_p12, %p1551_p11 }
  0x45   :  { %p1554_p0 = pnand %p1553_p13, %p1547_p10 }
 0x114   :  { %v133_v5 = vpop.f32.mrb[0].mxu0 }
 0x115   :  { %v134_v6 = vadd.f32 %v1723_v4, %v133_v5  ;;  %v1306_v7 = vpop.f32.mrb[1].mxu0 }
 0x116   :  { %v136_v8 = vpop.f32.mrb[2].mxu0 }
 0x117   :  { %v1726_v9 = vpack.c.bf16 %v134_v6, %v134_v6  ;;  %v1307_v10 = vpop.f32.mrb[3].mxu0 }
 0x119   :  { %255 = vrot.lane.b32.xlu1 %v1726_v9, %s1605_s11  ;;  %141 = vrot.lane.b32.xlu0 %v1726_v9, %s1606_s12 }
 0x11d   :  { %375 = vrot.lane.b32.xlu1 %v1726_v9, %s1607_s13  ;;  %257 = vrot.lane.b32.xlu0 %v1726_v9, %s1608_s2 }
 0x121   :  { %493 = vrot.lane.b32.xlu1 %v1726_v9, %s1609_s14  ;;  %373 = vrot.lane.b32.xlu0 %v1726_v9, %s1610_s15 }
 0x125   :  { %491 = vrot.lane.b32.xlu0 %v1726_v9, %s1611_s16 }
 0x18b   :  { %v142_v11 = vpop.permute.xlu0 %141  ;;  %v256_v14 = vpop.permute.xlu1 %255 }
 0x18c   :  { %v148_v12 = vsel %vm143_vm2, %v142_v11, 0 }
 0x18d   :  { %1309 = vmatpush3.bf16.xpose.msra.mxu1 %v148_v12 }
 0x18e   :  { %1320 = vmatprep.subr.bf16.mxu1 %v1603_v0 }
 0x18f   :  { %v258_v13 = vpop.permute.xlu0 %257  ;;  %v376_v16 = vpop.permute.xlu1 %375 }
 0x190   :  { %v263_v15 = vsel %vm143_vm2, %v258_v13, 0  ;;  %v381_v17 = vsel %vm143_vm2, %v376_v16, 0 }
 0x193   :  { %v494_v18 = vpop.permute.xlu1 %493  ;;  %v374_v19 = vpop.permute.xlu0 %373 }
 0x194   :  { %1311 = vmatmul.mubr.msk.bf16.vlgmr.msra.gmra.mrb[0].mxu1 %vm143_vm2, %v1726_v9  ;;  %v499_v20 = vsel %vm143_vm2, %v494_v18, 0 }
 0x195   :  { %1321 = vmatpush3.bf16.xpose.msra.mxu1 %v263_v15  ;;  %1322 = vmatprep.mubr.msk.bf16.mxu1 %vm1604_vm0, %v1603_v0 }
 0x196   :  { %1332 = vmatprep.subr.bf16.mxu1 %v1603_v0 }
 0x197   :  { %v492_v21 = vpop.permute.xlu0 %491 }
 0x19c   :  { %1323 = vmatmul.mubr.msk.bf16.vlgmr.msra.gmra.mrb[4].mxu1 %vm143_vm2, %v256_v14 }
 0x19d   :  { %1333 = vmatpush3.bf16.xpose.msra.mxu1 %v381_v17  ;;  %1334 = vmatprep.mubr.msk.bf16.mxu1 %vm1604_vm0, %v1603_v0 }
 0x19e   :  { %1344 = vmatprep.subr.bf16.mxu1 %v1603_v0 }
 0x1a4   :  { %1335 = vmatmul.mubr.msk.bf16.vlgmr.msra.gmra.mrb[8].mxu1 %vm143_vm2, %v374_v19 }
 0x1a5   :  { %1345 = vmatpush3.bf16.xpose.msra.mxu1 %v499_v20  ;;  %1346 = vmatprep.mubr.msk.bf16.mxu1 %vm1604_vm0, %v1603_v0 }
 0x1a6   :  { %1356 = vmatprep.subr.bf16.mxu1 %v1603_v0 }
 0x1ac   :  { %1347 = vmatmul.mubr.msk.bf16.vlgmr.msra.gmra.mrb[12].mxu1 %vm143_vm2, %v492_v21 }
 0x1ad   :  { %1357 = vmatpush3.bf16.msra.mxu1 %v1444_v1  ;;  %1360 = vmatprep.mubr.msk.bf16.mxu1 %vm1604_vm0, %v1603_v0 }
 0x1ae   :  { %1358 = vmatprep.subr.bf16.mxu1 %v1603_v0 }
 0x1b1   :  { %1359 = vmatpush3.bf16.msra.mxu1 %v1445_v2 }
 0x1b2   :  { %1370 = vmatprep.subr.bf16.mxu1 %v1603_v0 }
 0x1b4   :  { %1361 = vmatmul.mubr.msk.bf16.vlgmr.msra.gmra.mrb[16].mxu1 %vm95_vm1, %v613_v22 }
 0x1b5   :  { %1372 = vmatprep.mubr.msk.bf16.mxu1 %vm1604_vm0, %v1603_v0 }
 0x267   :  { %v184_v23 = vpop.f32.mrb[0].mxu1 }
 0x268   :  { %v1312_v24 = vpop.f32.mrb[1].mxu1  ;;  %v190_v25 = vsel %vm143_vm2, %v184_v23, -inf }
 0x269   :  { %191 = vmax.xlane.f32.xlu1 %v190_v25  ;;  %v187_v26 = vpop.f32.mrb[2].mxu1 }
 0x26a   :  { %v1313_v27 = vpop.f32.mrb[3].mxu1 }
 0x26f   :  { %v299_v28 = vpop.f32.mrb[4].mxu1 }
 0x270   :  { %v1324_v29 = vpop.f32.mrb[5].mxu1  ;;  %v305_v30 = vsel %vm143_vm2, %v299_v28, -inf }
 0x271   :  { %306 = vmax.xlane.f32.xlu0 %v305_v30  ;;  %v302_v31 = vpop.f32.mrb[6].mxu1 }
 0x272   :  { %v1325_v32 = vpop.f32.mrb[7].mxu1 }
 0x277   :  { %v417_v33 = vpop.f32.mrb[8].mxu1 }
 0x278   :  { %v1336_v34 = vpop.f32.mrb[9].mxu1  ;;  %v423_v35 = vsel %vm143_vm2, %v417_v33, -inf }
 0x279   :  { %424 = vmax.xlane.f32.xlu0 %v423_v35  ;;  %v420_v36 = vpop.f32.mrb[10].mxu1 }
 0x27a   :  { %v1337_v37 = vpop.f32.mrb[11].mxu1 }
 0x27f   :  { %v535_v38 = vpop.f32.mrb[12].mxu1 }
 0x280   :  { %v1348_v39 = vpop.f32.mrb[13].mxu1  ;;  %v541_v40 = vsel %vm143_vm2, %v535_v38, -inf }
 0x281   :  { %542 = vmax.xlane.f32.xlu1 %v541_v40  ;;  %v538_v41 = vpop.f32.mrb[14].mxu1 }
 0x282   :  { %v1349_v42 = vpop.f32.mrb[15].mxu1 }
 0x287   :  { %v651_v43 = vpop.f32.mrb[16].mxu1 }
 0x288   :  { %v1362_v44 = vpop.f32.mrb[17].mxu1  ;;  %v652_v5 = vadd.f32 %v1723_v4, %v651_v43 }
 0x289   :  { %v654_v45 = vpop.f32.mrb[18].mxu1 }
 0x28a   :  { %v1363_v46 = vpop.f32.mrb[19].mxu1  ;;  %v1783_v6 = vpack.c.bf16 %v652_v5, %v652_v5 }
 0x292   :  { %318 = vrot.lane.b32.xlu1 %v1726_v9, %s1612_s17 }
 0x2f6   :  { %v192_v47 = vpop.xlane.xlu1 %191 }
 0x2f7   :  { %v193_v48 = vsub.f32 %v184_v23, %v192_v47 }
 0x2f9   :  { %v194_v49 = vmul.f32 1.442695, %v193_v48 }
 0x2fb   :  { %1448 = vpow2.f32 %v194_v49 }
 0x2fe   :  { %v307_v50 = vpop.xlane.xlu0 %306 }
 0x2ff   :  { %v308_v51 = vsub.f32 %v299_v28, %v307_v50 }
 0x301   :  { %v309_v52 = vmul.f32 1.442695, %v308_v51 }
 0x303   :  { %1450 = vpow2.f32 %v309_v52 }
 0x305   :  { %v1449_v53 = vpop.eup %1448 }
 0x306   :  { %v196_v54 = vsel %vm143_vm2, %v1449_v53, 0.0  ;;  %v425_v57 = vpop.xlane.xlu0 %424 }
 0x307   :  { %197 = vadd.xlane.f32.xlu0 %v196_v54  ;;  %v426_v58 = vsub.f32 %v417_v33, %v425_v57 }
 0x309   :  { %v427_v59 = vmul.f32 1.442695, %v426_v58 }
 0x30b   :  { %1452 = vpow2.f32 %v427_v59 }
 0x30d   :  { %v1451_v55 = vpop.eup %1450 }
 0x30e   :  { %v311_v56 = vsel %vm143_vm2, %v1451_v55, 0.0  ;;  %v543_v60 = vpop.xlane.xlu1 %542 }
 0x30f   :  { %312 = vadd.xlane.f32.xlu1 %v311_v56  ;;  %v544_v61 = vsub.f32 %v535_v38, %v543_v60 }
 0x311   :  { %v545_v62 = vmul.f32 1.442695, %v544_v61 }
 0x312   :  { %v319_v7 = vpop.permute.xlu1 %318 }
 0x313   :  { %1454 = vpow2.f32 %v545_v62  ;;  %v324_v14 = vsel %vm208_vm3, %v319_v7, 0 }
 0x315   :  { %v1453_v63 = vpop.eup %1452 }
 0x316   :  { %v429_v1 = vsel %vm143_vm2, %v1453_v63, 0.0 }
 0x31d   :  { %203 = vrot.lane.b32.xlu0 %v1726_v9, %s1600_s9  ;;  %v1455_v2 = vpop.eup %1454 }
 0x31e   :  { %v547_v3 = vsel %vm143_vm2, %v1455_v2, 0.0 }
 0x320   :  { %436 = vrot.lane.b32.xlu1 %v1726_v9, %s1613_s18 }
 0x33c   :  { %430 = vadd.xlane.f32.xlu0 %v429_v1 }
 0x344   :  { %548 = vadd.xlane.f32.xlu1 %v547_v3 }
 0x352   :  { %554 = vrot.lane.b32.xlu0 %v1726_v9, %s1614_s19 }
 0x355   :  { %659 = vrot.lane.b32.xlu1 %v1783_v6, %s1606_s12 }
 0x356   :  { %776 = vrot.lane.b32.xlu0 %v1783_v6, %s1608_s2 }
 0x359   :  { %774 = vrot.lane.b32.xlu1 %v1783_v6, %s1605_s11 }
 0x35a   :  { %895 = vrot.lane.b32.xlu0 %v1783_v6, %s1607_s13 }
 0x35d   :  { %893 = vrot.lane.b32.xlu1 %v1783_v6, %s1610_s15 }
 0x35e   :  { %1014 = vrot.lane.b32.xlu0 %v1783_v6, %s1609_s14 }
 0x361   :  { %1012 = vrot.lane.b32.xlu1 %v1783_v6, %s1611_s16 }
 0x394   :  { %v198_v4 = vpop.xlane.xlu0 %197 }
 0x395   :  { %1456 = vrcp.f32 %v198_v4 }
 0x398   :  { %v204_v8 = vpop.permute.xlu0 %203 }
 0x399   :  { %v210_v9 = vsel %vm208_vm3, %v204_v8, 0 }
 0x39a   :  { %1315 = vmatpush3.bf16.msra.mxu0 %v210_v9 }
 0x39b   :  { %1326 = vmatprep.subr.bf16.mxu0 %v1603_v0 }
 0x39c   :  { %v313_v10 = vpop.xlane.xlu1 %312 }
 0x39d   :  { %1458 = vrcp.f32 %v313_v10 }
 0x39f   :  { %v1457_v11 = vpop.eup %1456 }
 0x3a0   :  { %v200_v12 = vmul.f32 %v1457_v11, %v1449_v53  ;;  %v437_v17 = vpop.permute.xlu1 %436 }
 0x3a1   :  { %v442_v19 = vsel %vm208_vm3, %v437_v17, 0 }
 0x3a2   :  { %v202_v13 = vpack.c.bf16 %v200_v12, %v200_v12 }
 0x3a4   :  { %1317 = vmatmul.mubr.msk.bf16.vlgmr.msra.gmra.mrb[4].mxu0 %vm143_vm2, %v202_v13 }
 0x3a5   :  { %1327 = vmatpush3.bf16.msra.mxu0 %v324_v14  ;;  %1328 = vmatprep.mubr.msk.bf16.mxu0 %vm1604_vm0, %v1603_v0 }
 0x3a6   :  { %1338 = vmatprep.subr.bf16.mxu0 %v1603_v0 }
 0x3a7   :  { %v1459_v15 = vpop.eup %1458 }
 0x3a8   :  { %v315_v16 = vmul.f32 %v1459_v15, %v1451_v55 }
 0x3aa   :  { %v317_v18 = vpack.c.bf16 %v315_v16, %v315_v16  ;;  %v316_v27 = vadd.f32 %v315_v16, %v200_v12 }
 0x3ac   :  { %1329 = vmatmul.mubr.msk.bf16.vlgmr.msra.gmra.mrb[8].mxu0 %vm143_vm2, %v317_v18 }
 0x3ad   :  { %1339 = vmatpush3.bf16.msra.mxu0 %v442_v19  ;;  %1340 = vmatprep.mubr.msk.bf16.mxu0 %vm1604_vm0, %v1603_v0 }
 0x3ae   :  { %1350 = vmatprep.subr.bf16.mxu0 %v1603_v0 }
 0x3c9   :  { %v431_v20 = vpop.xlane.xlu0 %430 }
 0x3ca   :  { %1460 = vrcp.f32 %v431_v20 }
 0x3cd   :  { %v555_v24 = vpop.permute.xlu0 %554 }
 0x3ce   :  { %v560_v26 = vsel %vm208_vm3, %v555_v24, 0 }
 0x3d1   :  { %v549_v21 = vpop.xlane.xlu1 %548  ;;  %v777_v36 = vpop.permute.xlu0 %776 }
 0x3d2   :  { %1462 = vrcp.f32 %v549_v21  ;;  %v782_v37 = vsel %vm143_vm2, %v777_v36, 0 }
 0x3d4   :  { %v1461_v22 = vpop.eup %1460 }
 0x3d5   :  { %v433_v23 = vmul.f32 %v1461_v22, %v1453_v63  ;;  %v660_v31 = vpop.permute.xlu1 %659  ;;  %v896_v39 = vpop.permute.xlu0 %895 }
 0x3d6   :  { %v665_v34 = vsel %vm143_vm2, %v660_v31, 0  ;;  %v901_v40 = vsel %vm143_vm2, %v896_v39, 0 }
 0x3d7   :  { %v435_v25 = vpack.c.bf16 %v433_v23, %v433_v23  ;;  %v434_v29 = vadd.f32 %v433_v23, %v316_v27 }
 0x3d9   :  { %1341 = vmatmul.mubr.msk.bf16.vlgmr.msra.gmra.mrb[12].mxu0 %vm143_vm2, %v435_v25  ;;  %v775_v38 = vpop.permute.xlu1 %774  ;;  %v1015_v41 = vpop.permute.xlu0 %1014 }
 0x3da   :  { %1351 = vmatpush3.bf16.msra.mxu0 %v560_v26  ;;  %1352 = vmatprep.mubr.msk.bf16.mxu0 %vm1604_vm0, %v1603_v0  ;;  %v1020_v43 = vsel %vm143_vm2, %v1015_v41, 0 }
 0x3db   :  { %1364 = vmatprep.subr.bf16.mxu0 %v1603_v0 }
 0x3dc   :  { %v1463_v28 = vpop.eup %1462 }
 0x3dd   :  { %v551_v30 = vmul.f32 %v1463_v28, %v1455_v2  ;;  %v894_v42 = vpop.permute.xlu1 %893 }
 0x3df   :  { %v553_v32 = vpack.c.bf16 %v551_v30, %v551_v30  ;;  %v552_v33 = vadd.f32 %v551_v30, %v434_v29 }
 0x3e1   :  { %1353 = vmatmul.mubr.msk.bf16.vlgmr.msra.gmra.mrb[16].mxu0 %vm143_vm2, %v553_v32  ;;  %v609_v35 = vmul.f32 0.25, %v552_v33  ;;  %v1013_v44 = vpop.permute.xlu1 %1012 }
 0x3e2   :  { %1366 = vmatprep.mubr.msk.bf16.mxu0 %vm1604_vm0, %v1603_v0 }
 0x3e3   :  { %1365 = vmatpush3.bf16.xpose.msra.mxu0 %v665_v34  ;;  %611 = vst.msk [vmem:[#allocation10] sm:$0x1] %vm610_vm4, %v609_v35 }
 0x3e4   :  { %1376 = vmatprep.subr.bf16.mxu0 %v1603_v0 }
 0x3ea   :  { %1367 = vmatmul.mubr.msk.bf16.vlgmr.msra.gmra.mrb[20].mxu0 %vm143_vm2, %v1783_v6 }
 0x3eb   :  { %1377 = vmatpush3.bf16.xpose.msra.mxu0 %v782_v37  ;;  %1378 = vmatprep.mubr.msk.bf16.mxu0 %vm1604_vm0, %v1603_v0 }
 0x3ec   :  { %1388 = vmatprep.subr.bf16.mxu0 %v1603_v0 }
 0x3f2   :  { %1379 = vmatmul.mubr.msk.bf16.vlgmr.msra.gmra.mrb[24].mxu0 %vm143_vm2, %v775_v38 }
 0x3f3   :  { %1389 = vmatpush3.bf16.xpose.msra.mxu0 %v901_v40  ;;  %1390 = vmatprep.mubr.msk.bf16.mxu0 %vm1604_vm0, %v1603_v0 }
 0x3f4   :  { %1400 = vmatprep.subr.bf16.mxu0 %v1603_v0 }
 0x3fa   :  { %1391 = vmatmul.mubr.msk.bf16.vlgmr.msra.gmra.mrb[28].mxu0 %vm143_vm2, %v894_v42 }
 0x3fb   :  { %1401 = vmatpush3.bf16.xpose.msra.mxu0 %v1020_v43  ;;  %1402 = vmatprep.mubr.msk.bf16.mxu0 %vm1604_vm0, %v1603_v0 }
 0x3fc   :  { %1412 = vmatprep.subr.bf16.mxu0 %v1603_v0 }
 0x402   :  { %1403 = vmatmul.mubr.msk.bf16.vlgmr.msra.gmra.mrb[32].mxu0 %vm143_vm2, %v1013_v44 }
 0x403   :  { %1416 = vmatprep.mubr.msk.bf16.mxu0 %vm1604_vm0, %v1603_v0 }
 0x477   :  { %v246_v45 = vpop.f32.mrb[4].mxu0 }
 0x478   :  { %v252_v46 = vpack.c.bf16 %v246_v45, %v246_v45  ;;  %v1318_v47 = vpop.f32.mrb[5].mxu0 }
 0x479   :  { %v249_v48 = vpop.f32.mrb[6].mxu0 }
 0x47a   :  { %254 = vst.msk [vmem:[#allocation2] sm:$0xf] %vm253_vm5, %v252_v46  ;;  %v1319_v49 = vpop.f32.mrb[7].mxu0 }
 0x47f   :  { %v1843_v50 = vpop.f32.mrb[8].mxu0 }
 0x480   :  { %v1330_v51 = vpop.f32.mrb[9].mxu0  ;;  %v366_v38 = vpack.c.bf16 %v1843_v50, %v1843_v50 }
 0x481   :  { %v363_v52 = vpop.f32.mrb[10].mxu0 }
 0x482   :  { %v1331_v53 = vpop.f32.mrb[11].mxu0 }
 0x4ac   :  { %v1845_v54 = vpop.f32.mrb[12].mxu0 }
 0x4ad   :  { %v1342_v55 = vpop.f32.mrb[13].mxu0  ;;  %v484_v40 = vpack.c.bf16 %v1845_v54, %v1845_v54 }
 0x4ae   :  { %v481_v56 = vpop.f32.mrb[14].mxu0 }
 0x4af   :  { %v1343_v57 = vpop.f32.mrb[15].mxu0 }
 0x4b4   :  { %v1847_v58 = vpop.f32.mrb[16].mxu0 }
 0x4b5   :  { %v1354_v59 = vpop.f32.mrb[17].mxu0  ;;  %v602_v42 = vpack.c.bf16 %v1847_v58, %v1847_v58 }
 0x4b6   :  { %v599_v60 = vpop.f32.mrb[18].mxu0 }
 0x4b7   :  { %v1355_v61 = vpop.f32.mrb[19].mxu0 }
 0x4bd   :  { %v701_v62 = vpop.f32.mrb[20].mxu0 }
 0x4be   :  { %v1368_v63 = vpop.f32.mrb[21].mxu0  ;;  %v707_v1 = vsel %vm143_vm2, %v701_v62, -inf }
 0x4bf   :  { %708 = vmax.xlane.f32.xlu0 %v707_v1  ;;  %v704_v2 = vpop.f32.mrb[22].mxu0 }
 0x4c0   :  { %v1369_v3 = vpop.f32.mrb[23].mxu0 }
 0x4c5   :  { %v818_v5 = vpop.f32.mrb[24].mxu0 }
 0x4c6   :  { %v1380_v4 = vpop.f32.mrb[25].mxu0  ;;  %v824_v7 = vsel %vm143_vm2, %v818_v5, -inf }
 0x4c7   :  { %825 = vmax.xlane.f32.xlu1 %v824_v7  ;;  %v821_v8 = vpop.f32.mrb[26].mxu0 }
 0x4c8   :  { %v1381_v9 = vpop.f32.mrb[27].mxu0 }
 0x4cd   :  { %v937_v10 = vpop.f32.mrb[28].mxu0 }
 0x4ce   :  { %v1392_v11 = vpop.f32.mrb[29].mxu0  ;;  %v943_v12 = vsel %vm143_vm2, %v937_v10, -inf }
 0x4cf   :  { %944 = vmax.xlane.f32.xlu0 %v943_v12  ;;  %v940_v13 = vpop.f32.mrb[30].mxu0 }
 0x4d0   :  { %v1393_v14 = vpop.f32.mrb[31].mxu0 }
 0x4d5   :  { %v1056_v15 = vpop.f32.mrb[32].mxu0 }
 0x4d6   :  { %v1404_v16 = vpop.f32.mrb[33].mxu0  ;;  %v1062_v17 = vsel %vm143_vm2, %v1056_v15, -inf }
 0x4d7   :  { %1063 = vmax.xlane.f32.xlu0 %v1062_v17  ;;  %v1059_v18 = vpop.f32.mrb[34].mxu0 }
 0x4d8   :  { %v1405_v19 = vpop.f32.mrb[35].mxu0 }
 0x54c   :  { %v709_v20 = vpop.xlane.xlu0 %708 }
 0x54d   :  { %v710_v21 = vsub.f32 %v701_v62, %v709_v20 }
 0x54f   :  { %v711_v22 = vmul.f32 1.442695, %v710_v21 }
 0x551   :  { %1464 = vpow2.f32 %v711_v22 }
 0x554   :  { %v826_v23 = vpop.xlane.xlu1 %825 }
 0x555   :  { %v827_v24 = vsub.f32 %v818_v5, %v826_v23 }
 0x557   :  { %v828_v25 = vmul.f32 1.442695, %v827_v24  ;;  %v1446_v24 = vld [vmem:[#allocation8] sm:$0xff]  }
 0x558   :  { %1413 = vmatpush3.bf16.msra.mxu0 %v1446_v24 }
 0x559   :  { %1466 = vpow2.f32 %v828_v25  ;;  %1414 = vmatprep.subr.bf16.mxu0 %v1603_v0 }
 0x55b   :  { %v1465_v26 = vpop.eup %1464 }
 0x55c   :  { %v713_v27 = vsel %vm143_vm2, %v1465_v26, 0.0  ;;  %v945_v28 = vpop.xlane.xlu0 %944 }
 0x55d   :  { %714 = vadd.xlane.f32.xlu1 %v713_v27  ;;  %v946_v36 = vsub.f32 %v937_v10, %v945_v28  ;;  %v1447_v28 = vld [vmem:[#allocation8 + $0x8] sm:$0xff]  }
 0x55e   :  { %1415 = vmatpush3.bf16.msra.mxu0 %v1447_v28 }
 0x55f   :  { %v947_v37 = vmul.f32 1.442695, %v946_v36 }
 0x563   :  { %v1467_v29 = vpop.eup %1466 }
 0x564   :  { %v1064_v30 = vpop.xlane.xlu0 %1063  ;;  %v830_v31 = vsel %vm143_vm2, %v1467_v29, 0.0 }
 0x565   :  { %v1065_v32 = vsub.f32 %v1056_v15, %v1064_v30  ;;  %831 = vadd.xlane.f32.xlu0 %v830_v31 }
 0x567   :  { %v1066_v33 = vmul.f32 1.442695, %v1065_v32 }
 0x569   :  { %1468 = vpow2.f32 %v1066_v33 }
 0x56a   :  { %1470 = vpow2.f32 %v947_v37 }
 0x56e   :  { %720 = vrot.lane.b32.xlu1 %v1783_v6, %s1600_s9  ;;  %s1616_s9 = smov 16  }
 0x573   :  { %v1857_v34 = vpop.eup %1468 }
 0x574   :  { %v1068_v35 = vsel %vm143_vm2, %v1857_v34, 0.0  ;;  %v1471_v39 = vpop.eup %1470 }
 0x575   :  { %1069 = vadd.xlane.f32.xlu0 %v1068_v35  ;;  %v949_v41 = vsel %vm143_vm2, %v1471_v39, 0.0 }
 0x58b   :  { %837 = vrot.lane.b32.xlu0 %v1783_v6, %s1612_s17 }
 0x58f   :  { %368 = vrot.lane.b32.xlu0 %v366_v38, %s1615_s20 }
 0x592   :  { %950 = vadd.xlane.f32.xlu1 %v949_v41 }
 0x593   :  { %486 = vrot.lane.b32.xlu0 %v484_v40, %s1616_s9 }
 0x597   :  { %604 = vrot.lane.b32.xlu0 %v602_v42, %s1617_s1 }
 0x5a3   :  { %956 = vrot.lane.b32.xlu1 %v1783_v6, %s1613_s18 }
 0x5a7   :  { %1075 = vrot.lane.b32.xlu1 %v1783_v6, %s1614_s19 }
 0x5ea   :  { %v715_v43 = vpop.xlane.xlu1 %714 }
 0x5eb   :  { %1472 = vrcp.f32 %v715_v43 }
 0x5ee   :  { %v721_v44 = vpop.permute.xlu1 %720 }
 0x5ef   :  { %v726_v45 = vsel %vm208_vm3, %v721_v44, 0 }
 0x5f0   :  { %1371 = vmatpush3.bf16.msra.mxu1 %v726_v45 }
 0x5f1   :  { %1382 = vmatprep.subr.bf16.mxu1 %v1603_v0 }
 0x5f2   :  { %v832_v47 = vpop.xlane.xlu0 %831 }
 0x5f3   :  { %1474 = vrcp.f32 %v832_v47 }
 0x5f5   :  { %v1473_v46 = vpop.eup %1472 }
 0x5f6   :  { %v717_v48 = vmul.f32 %v1473_v46, %v1465_v26 }
 0x5f8   :  { %v719_v49 = vpack.c.bf16 %v717_v48, %v717_v48 }
 0x5fa   :  { %1373 = vmatmul.mubr.msk.bf16.vlgmr.msra.gmra.mrb[20].mxu1 %vm143_vm2, %v719_v49 }
 0x5fb   :  { %1384 = vmatprep.mubr.msk.bf16.mxu1 %vm1604_vm0, %v1603_v0 }
 0x5fd   :  { %v1475_v50 = vpop.eup %1474 }
 0x5fe   :  { %v834_v51 = vmul.f32 %v1475_v50, %v1467_v29 }
 0x600   :  { %v836_v54 = vpack.c.bf16 %v834_v51, %v834_v51  ;;  %v835_v63 = vadd.f32 %v834_v51, %v717_v48 }
 0x602   :  { %v1070_v6 = vpop.xlane.xlu0 %1069 }
 0x603   :  { %1476 = vrcp.f32 %v1070_v6 }
 0x606   :  { %v838_v52 = vpop.permute.xlu0 %837 }
 0x607   :  { %v843_v53 = vsel %vm208_vm3, %v838_v52, 0 }
 0x608   :  { %1383 = vmatpush3.bf16.msra.mxu1 %v843_v53 }
 0x609   :  { %1394 = vmatprep.subr.bf16.mxu1 %v1603_v0 }
 0x60a   :  { %v369_v55 = vpop.permute.xlu0 %368 }
 0x60b   :  { %372 = vst.msk [vmem:[#allocation2] sm:$0xf] %vm371_vm6, %v369_v55  ;;  %1385 = vmatmul.mubr.msk.bf16.vlgmr.msra.gmra.mrb[24].mxu1 %vm143_vm2, %v836_v54 }
 0x60c   :  { %1396 = vmatprep.mubr.msk.bf16.mxu1 %vm1604_vm0, %v1603_v0 }
 0x60d   :  { %v1477_v61 = vpop.eup %1476 }
 0x60e   :  { %v487_v56 = vpop.permute.xlu0 %486  ;;  %v1072_v3 = vmul.f32 %v1477_v61, %v1857_v34 }
 0x60f   :  { %490 = vst.msk [vmem:[#allocation2] sm:$0xf] %vm489_vm7, %v487_v56 }
 0x610   :  { %v1074_v10 = vpack.c.bf16 %v1072_v3, %v1072_v3 }
 0x612   :  { %v605_v57 = vpop.permute.xlu0 %604 }
 0x613   :  { %608 = vst.msk [vmem:[#allocation2] sm:$0xf] %vm607_vm8, %v605_v57 }
 0x61f   :  { %v951_v58 = vpop.xlane.xlu1 %950 }
 0x620   :  { %1478 = vrcp.f32 %v951_v58 }
 0x623   :  { %v957_v59 = vpop.permute.xlu1 %956 }
 0x624   :  { %v962_v60 = vsel %vm208_vm3, %v957_v59, 0 }
 0x625   :  { %1395 = vmatpush3.bf16.msra.mxu1 %v962_v60 }
 0x626   :  { %1406 = vmatprep.subr.bf16.mxu1 %v1603_v0 }
 0x627   :  { %v1076_v2 = vpop.permute.xlu1 %1075 }
 0x628   :  { %v1081_v7 = vsel %vm208_vm3, %v1076_v2, 0 }
 0x62a   :  { %v1479_v62 = vpop.eup %1478 }
 0x62b   :  { %v953_v1 = vmul.f32 %v1479_v62, %v1471_v39 }
 0x62d   :  { %v954_v5 = vadd.f32 %v953_v1, %v835_v63  ;;  %v955_v4 = vpack.c.bf16 %v953_v1, %v953_v1 }
 0x62f   :  { %1397 = vmatmul.mubr.msk.bf16.vlgmr.msra.gmra.mrb[28].mxu1 %vm143_vm2, %v955_v4  ;;  %v1073_v8 = vadd.f32 %v1072_v3, %v954_v5 }
 0x630   :  { %1407 = vmatpush3.bf16.msra.mxu1 %v1081_v7  ;;  %1408 = vmatprep.mubr.msk.bf16.mxu1 %vm1604_vm0, %v1603_v0 }
 0x631   :  { %v1131_v9 = vmul.f32 0.25, %v1073_v8 }
 0x633   :  { %1133 = vst.msk [vmem:[#allocation10 + $0x1] sm:$0x1] %vm610_vm4, %v1131_v9 }
 0x637   :  { %1409 = vmatmul.mubr.msk.bf16.vlgmr.msra.gmra.mrb[32].mxu1 %vm143_vm2, %v1074_v10 }
 0x6cd   :  { %v762_v11 = vpop.f32.mrb[20].mxu1 }
 0x6ce   :  { %v768_v12 = vpack.c.bf16 %v762_v11, %v762_v11  ;;  %v1374_v13 = vpop.f32.mrb[21].mxu1 }
 0x6cf   :  { %v765_v14 = vpop.f32.mrb[22].mxu1 }
 0x6d0   :  { %v770_v15 = vrot.slane %v768_v12, 4  ;;  %v1375_v16 = vpop.f32.mrb[23].mxu1 }
 0x6d2   :  { %773 = vst.msk [vmem:[#allocation2] sm:$0xf0] %vm772_vm9, %v770_v15 }
 0x6de   :  { %v879_v17 = vpop.f32.mrb[24].mxu1 }
 0x6df   :  { %v885_v18 = vpack.c.bf16 %v879_v17, %v879_v17  ;;  %v1386_v19 = vpop.f32.mrb[25].mxu1 }
 0x6e0   :  { %v882_v20 = vpop.f32.mrb[26].mxu1 }
 0x6e1   :  { %v887_v21 = vrot.slane %v885_v18, 4  ;;  %v1387_v22 = vpop.f32.mrb[27].mxu1 }
 0x6e3   :  { %888 = vrot.lane.b32.xlu1 %v887_v21, %s1615_s20 }
 0x702   :  { %v998_v23 = vpop.f32.mrb[28].mxu1 }
 0x703   :  { %v1004_v25 = vpack.c.bf16 %v998_v23, %v998_v23  ;;  %v1398_v26 = vpop.f32.mrb[29].mxu1 }
 0x704   :  { %v1001_v27 = vpop.f32.mrb[30].mxu1 }
 0x705   :  { %v1006_v29 = vrot.slane %v1004_v25, 4  ;;  %v1399_v30 = vpop.f32.mrb[31].mxu1 }
 0x707   :  { %1007 = vrot.lane.b32.xlu1 %v1006_v29, %s1616_s9 }
 0x70a   :  { %v1117_v31 = vpop.f32.mrb[32].mxu1 }
 0x70b   :  { %v1123_v32 = vpack.c.bf16 %v1117_v31, %v1117_v31  ;;  %v1410_v33 = vpop.f32.mrb[33].mxu1 }
 0x70c   :  { %v1120_v34 = vpop.f32.mrb[34].mxu1 }
 0x70d   :  { %v1125_v35 = vrot.slane %v1123_v32, 4  ;;  %v1411_v36 = vpop.f32.mrb[35].mxu1 }
 0x70f   :  { %1126 = vrot.lane.b32.xlu1 %v1125_v35, %s1617_s1 }
 0x755   :  { %v889_v37 = vpop.permute.xlu1 %888 }
 0x756   :  { %892 = vst.msk [vmem:[#allocation2] sm:$0xf0] %vm891_vm10, %v889_v37 }
 0x779   :  { %v1008_v38 = vpop.permute.xlu1 %1007 }
 0x77a   :  { %1011 = vst.msk [vmem:[#allocation2] sm:$0xf0] %vm1010_vm11, %v1008_v38 }
 0x781   :  { %v1127_v39 = vpop.permute.xlu1 %1126 }
 0x782   :  { %1130 = vst.msk [vmem:[#allocation2] sm:$0xf0] %vm1129_vm12, %v1127_v39 }
 0x789   :  { %v1134_v0 = vld [vmem:[#allocation2] sm:$0xff] }
 0x78a   :  { %1417 = vmatmul.mubr.msk.bf16.vlgmr.msra.gmra.mrb[36].mxu0 %vm95_vm1, %v1134_v0 }
 0x78b   :  { %1557 = shalt.err (!%p1554_p0)
}
 0x78c   :  { %s1558_s27 = scalar_lea.hbm %s1939_s6, 32 }
 0x78d   :  { %p1559_p1 = scmp.ne.s32.totalorder %s1939_s6, %s1558_s27  ;;  %p1562_p2 = scmp.lt.u32.totalorder %s1558_s27, %s1939_s6 }
 0x78f   :  { %p1564_p3 = pnand %p1562_p2, %p1559_p1 }
 0x791   :  { %1567 = shalt.err (!%p1564_p3)
}
 0x792   :  { %s1619_s8 = smov 1   ;;  %v1255_v40 = vld [vmem:[%s1937_s4] ss:$0 sm:$0xff]  ;;  %s1620_s11 = smov [#allocation9]  }
 0x793   :  { %1223 = dma.vmem_to_hbm [thread:$0]  %s1218_s22, 32, %s1939_s6, [#allocation11], %s1616_s9, %s1616_s9, %s1619_s8  }
 0x794   :  { %s1205_s12 = sshll.u32 %s1620_s11, 4  ;;  %s1206_s12 = int_to_ptr.vmem [resolvable:$true] %s1205_s12 }
 0x795   :  { %s1568_s13 = scalar_lea.vmem %s1206_s12, 256  ;;  %p1573_p5 = scmp.lt.s32.totalorder %s1206_s12, %s1206_s12 }
 0x796   :  { %p1569_p4 = scmp.ne.s32.totalorder %s1206_s12, %s1568_s13  ;;  %p1574_p6 = scmp.lt.s32.totalorder %s1568_s13, %s1568_s13 }
 0x798   :  { %p1575_p7 = por %p1574_p6, %p1573_p5 }
 0x79a   :  { %p1576_p8 = pnand %p1575_p7, %p1569_p4 }
 0x85d   :  { %v1190_v41 = vpop.f32.mrb[36].mxu0 }
 0x85e   :  { %v1191_v42 = vadd.f32 %v1255_v40, %v1190_v41  ;;  %v1418_v43 = vpop.f32.mrb[37].mxu0 }
 0x85f   :  { %v1193_v44 = vpop.f32.mrb[38].mxu0 }
 0x860   :  { %1197 = vst.msk [vmem:[#allocation9] sm:$0xff] %vm95_vm1, %v1191_v42  ;;  %v1194_v45 = vadd.f32 %v1255_v40, %v1193_v44  ;;  %v1419_v46 = vpop.f32.mrb[39].mxu0 }
 0x862   :  { %1199 = vst.msk [vmem:[#allocation9 + $0x8] sm:$0xff] %vm95_vm1, %v1194_v45 }
 0x863   :  { %1579 = shalt.err (!%p1576_p8)
}
 0x864   :  { %s1580_s2 = scalar_lea.hbm %s1938_s5, 256 }
 0x865   :  { %p1581_p9 = scmp.ne.s32.totalorder %s1938_s5, %s1580_s2  ;;  %p1584_p10 = scmp.lt.u32.totalorder %s1580_s2, %s1938_s5 }
 0x867   :  { %p1586_p11 = pnand %p1584_p10, %p1581_p9 }
 0x869   :  { %1589 = shalt.err (!%p1586_p11)
}
 0x86a   :  { %s1621_s18 = smov 128  }
 0x86b   :  { %1211 = dma.vmem_to_hbm [thread:$0]  %s1206_s12, 256, %s1938_s5, [#allocation5], %s1621_s18, %s1621_s18, %s1615_s20  }
 0x86c   :  { %1594 = dma.done.wait [#allocation5], 256  }
 0x86d   :  { %1595 = vsyncadd [#allocation5], 4294967040 }
 0x86e   :  { %1596 = dma.done.wait [#allocation11], 32  }
 0x86f   :  { %1597 = vsyncadd [#allocation11], 4294967264 }
 0x870   :  { %1230 = vsyncpa [#allocation4], 1 }
 0x871   :  { %1231 = vsyncpa [#allocation7], 1 }
 0x872   :  { %1232 = vsyncpa [#allocation5], 1 }
 0x873   :  { %1233 = vsyncpa [#allocation11], 1 }

</bundles_post_ra>
